<compile_context>
chip_gen: v7x
topology: tpu7x:2x2x1
jax: 0.10.0
libtpu: 0.0.40
codegen_flags: <defaults>
</compile_context>

<pallas_src>
import jax
import jax.numpy as jnp
from jax.experimental import pallas as pl
from jax.experimental.pallas import tpu as pltpu


def _attention_kernel(enc_ref, hp_ref, w1e_ref, w2_ref, out_ref):
    """One grid step == TB batch elements, fully resident in VMEM."""
    TB, S, D = enc_ref.shape

    enc = enc_ref[...]                                        # (TB, S, D) f32
    enc2d = enc.reshape(TB * S, D)                            # collapse leading dims

    # linear1, encoder half: one big MXU matmul (M = TB*S), bf16 in / f32 accum.
    x = jnp.dot(enc2d.astype(w1e_ref.dtype), w1e_ref[...],
                preferred_element_type=jnp.float32)           # (TB*S, D) f32

    # Add the pre-computed per-batch hidden projection (+ bias), tanh in f32.
    x = x.reshape(TB, S, D) + hp_ref[...][:, None, :]         # (TB, S, D)
    a = jnp.tanh(x)

    # linear2 (no bias): logits with S on the lane axis.
    logits = jnp.sum(a * w2_ref[...][None, :, :], axis=-1)    # (TB, S)

    # Softmax over the sequence axis (lane reductions only).
    m = jnp.max(logits, axis=-1, keepdims=True)
    e = jnp.exp(logits - m)
    alpha = e / jnp.sum(e, axis=-1, keepdims=True)            # (TB, S)

    # context = alpha @ enc, per batch element (batched MXU matmul).
    ctx = jnp.einsum("bqs,bsd->bqd", alpha[:, None, :], enc,
                     preferred_element_type=jnp.float32)      # (TB, 1, D)
    out_ref[...] = ctx.reshape(TB, D)                         # dense (TB, D) store


def _round_up(x, m):
    return ((x + m - 1) // m) * m


def _choose_tb(batch, seq_len, target_rows=256):
    # TB*S >= ~256 keeps the MXU rows full on v6e/v7x; TB is a multiple of 8 so
    # the (TB, D) output tile is sublane-dense; never pad far beyond the batch.
    tb = _round_up(max(1, -(-target_rows // seq_len)), 8)
    return min(tb, _round_up(batch, 8))


def attention_pallas(hidden_state, encoder_outputs, w1, b1, w2, *,
                     tb=None, matmul_dtype=jnp.bfloat16):
    """Pallas forward of `Attention`.

    hidden_state    : (B, D)    f32
    encoder_outputs : (B, S, D) f32
    w1 : (2D, D)  == linear1.weight.T  (rows [:D] multiply enc, rows [D:] multiply hidden)
    b1 : (D,)     == linear1.bias
    w2 : (1, D)   == linear2.weight   (no bias)
    """
    B, S, D = encoder_outputs.shape
    if tb is None:
        tb = _choose_tb(B, S)
    b_pad = _round_up(B, tb)
    grid = b_pad // tb
    # TODO(synk): on v7x prefer a tb giving grid >= 2 when B allows it, so both
    #             TensorCores get work (moot at the tiny demo batch).

    w1_enc = w1[:D].astype(matmul_dtype)                      # (D, D) - stays in VMEM
    w1_hid = w1[D:].astype(matmul_dtype)                      # (D, D) - used outside

    # Hidden projection (+ bias) hoisted out of the kernel: one (B, D) @ (D, D).
    hid_proj = (jnp.dot(hidden_state.astype(matmul_dtype), w1_hid,
                        preferred_element_type=jnp.float32)
                + b1.astype(jnp.float32)[None, :])            # (B, D) f32

    enc = encoder_outputs.astype(jnp.float32)
    if b_pad != B:
        enc = jnp.pad(enc, ((0, b_pad - B), (0, 0), (0, 0)))
        hid_proj = jnp.pad(hid_proj, ((0, b_pad - B), (0, 0)))

    w2_row = w2.reshape(1, D).astype(jnp.float32)

    grid_spec = pltpu.PrefetchScalarGridSpec(
        num_scalar_prefetch=0,
        grid=(grid,),
        in_specs=[
            pl.BlockSpec((tb, S, D), lambda b: (b, 0, 0)),    # encoder outputs
            pl.BlockSpec((tb, D), lambda b: (b, 0)),          # hidden projection (+bias)
            pl.BlockSpec((D, D), lambda b: (0, 0)),           # W1 (encoder half, bf16)
            pl.BlockSpec((1, D), lambda b: (0, 0)),           # w2 row vector
        ],
        out_specs=pl.BlockSpec((tb, D), lambda b: (b, 0)),    # dense (tb, D) tile
    )

    out = pl.pallas_call(
        _attention_kernel,
        out_shape=jax.ShapeDtypeStruct((b_pad, D), jnp.float32),
        grid_spec=grid_spec,
        compiler_params=pltpu.CompilerParams(
            dimension_semantics=("parallel",),
            vmem_limit_bytes=64 * 1024 * 1024,
        ),
    )(enc, hid_proj, w1_enc, w2_row)
    return out[:B]


def attention_reference(hidden_state, encoder_outputs, w1, b1, w2,
                        matmul_dtype=jnp.bfloat16):
    """Pure-JAX mirror of the PyTorch forward (same bf16 cast on the linear1 matmul)."""
    B, S, D = encoder_outputs.shape
    hid = jnp.broadcast_to(hidden_state[:, None, :], (B, S, D))
    inputs = jnp.concatenate([encoder_outputs, hid], axis=-1).reshape(-1, 2 * D)
    lin1 = jnp.dot(inputs.astype(matmul_dtype), w1.astype(matmul_dtype),
                   preferred_element_type=jnp.float32) + b1[None, :]
    o = jnp.tanh(lin1)                                        # (B*S, D) f32
    e = jnp.sum(o * w2.reshape(1, D), axis=-1).reshape(B, S)
    alpha = jax.nn.softmax(e, axis=1)
    return jnp.einsum("bs,bsd->bd", alpha, encoder_outputs)


if __name__ == "__main__":
    # Small shapes consistent with the module: batch=2, seq=8, dim=32.
    B, S, D = 2, 8, 32
    key = jax.random.PRNGKey(0)
    k_enc, k_hid, k_w1, k_b1, k_w2 = jax.random.split(key, 5)

    encoder_outputs = jax.random.normal(k_enc, (B, S, D), jnp.float32)
    hidden_state = jax.random.normal(k_hid, (B, D), jnp.float32)

    # linear1: (2D -> D) stored in x @ W layout (== weight.T); linear2: (D -> 1), no bias.
    w1 = jax.random.normal(k_w1, (2 * D, D), jnp.float32) / jnp.sqrt(2.0 * D)
    b1 = 0.1 * jax.random.normal(k_b1, (D,), jnp.float32)
    w2 = jax.random.normal(k_w2, (1, D), jnp.float32) / jnp.sqrt(1.0 * D)

    out = attention_pallas(hidden_state, encoder_outputs, w1, b1, w2)
    out = jax.block_until_ready(out)

    ref = attention_reference(hidden_state, encoder_outputs, w1, b1, w2)
    assert out.shape == (B, D)
    assert jnp.allclose(out, ref, atol=1e-4, rtol=1e-4), (
        "Pallas kernel mismatch vs reference: max abs err "
        f"{float(jnp.max(jnp.abs(out - ref)))}")

    print("KERNEL_OK")
</pallas_src>

<mosaic_0001>
module attributes {stable_mosaic.version = 11 : i64} {
  func.func @_attention_kernel(%arg0: i32, %arg1: memref<8x8x32xf32, #tpu.memory_space<vmem>>, %arg2: memref<8x32xf32, #tpu.memory_space<vmem>>, %arg3: memref<32x32xbf16, #tpu.memory_space<vmem>>, %arg4: memref<1x32xf32, #tpu.memory_space<vmem>>, %arg5: memref<8x32xf32, #tpu.memory_space<vmem>>) attributes {dimension_semantics = [#tpu.dimension_semantics<parallel>], iteration_bounds = array<i64: 1>, scalar_prefetch = 0 : i64, scratch_operands = 0 : i64, tpu.core_type = #tpu.core_type<tc>, window_params = [{transform_indices = @transform_0, window_bounds = array<i64: 8, 8, 32>}, {transform_indices = @transform_1, window_bounds = array<i64: 8, 32>}, {pipeline_mode = #tpu.pipeline_mode<synchronous>, transform_indices = @transform_2, window_bounds = array<i64: 32, 32>}, {pipeline_mode = #tpu.pipeline_mode<synchronous>, transform_indices = @transform_3, window_bounds = array<i64: 1, 32>}, {transform_indices = @transform_4, window_bounds = array<i64: 8, 32>}]} {
    %c0 = arith.constant 0 : index
    %c0_0 = arith.constant 0 : index
    %c0_1 = arith.constant 0 : index
    %0 = vector.load %arg1[%c0, %c0_0, %c0_1] : memref<8x8x32xf32, #tpu.memory_space<vmem>>, vector<8x8x32xf32>
    %1 = vector.shape_cast %0 : vector<8x8x32xf32> to vector<64x32xf32>
    %2 = arith.truncf %1 : vector<64x32xf32> to vector<64x32xbf16>
    %c0_2 = arith.constant 0 : index
    %c0_3 = arith.constant 0 : index
    %3 = vector.load %arg3[%c0_2, %c0_3] : memref<32x32xbf16, #tpu.memory_space<vmem>>, vector<32x32xbf16>
    %cst = arith.constant dense<0.000000e+00> : vector<64x32xf32>
    %4 = tpu.matmul %2, %3, %cst {dimension_numbers = #tpu.dot_dimension_numbers<[1], [0], [0], [1], [0, 0, 1, 1], [], []>} : vector<64x32xbf16>, vector<32x32xbf16>, vector<64x32xf32> -> vector<64x32xf32>
    %5 = vector.shape_cast %4 : vector<64x32xf32> to vector<8x8x32xf32>
    %c0_4 = arith.constant 0 : index
    %c0_5 = arith.constant 0 : index
    %6 = vector.load %arg2[%c0_4, %c0_5] : memref<8x32xf32, #tpu.memory_space<vmem>>, vector<8x32xf32>
    %7 = vector.shape_cast %6 : vector<8x32xf32> to vector<8x1x32xf32>
    %8 = vector.broadcast %7 : vector<8x1x32xf32> to vector<8x8x32xf32>
    %9 = arith.addf %5, %8 : vector<8x8x32xf32>
    %10 = math.tanh %9 : vector<8x8x32xf32>
    %c0_6 = arith.constant 0 : index
    %c0_7 = arith.constant 0 : index
    %11 = vector.load %arg4[%c0_6, %c0_7] : memref<1x32xf32, #tpu.memory_space<vmem>>, vector<1x32xf32>
    %12 = vector.shape_cast %11 : vector<1x32xf32> to vector<1x1x32xf32>
    %13 = vector.broadcast %12 : vector<1x1x32xf32> to vector<8x8x32xf32>
    %14 = arith.mulf %10, %13 : vector<8x8x32xf32>
    %cst_8 = arith.constant dense<0.000000e+00> : vector<8x8xf32>
    %15 = vector.multi_reduction <add>, %14, %cst_8 [2] : vector<8x8x32xf32> to vector<8x8xf32>
    %cst_9 = arith.constant dense<0xFF800000> : vector<8xf32>
    %16 = vector.multi_reduction <maximumf>, %15, %cst_9 [1] : vector<8x8xf32> to vector<8xf32>
    %17 = vector.shape_cast %16 : vector<8xf32> to vector<8x1xf32>
    %18 = vector.broadcast %17 : vector<8x1xf32> to vector<8x8xf32>
    %19 = arith.subf %15, %18 : vector<8x8xf32>
    %20 = math.exp %19 : vector<8x8xf32>
    %cst_10 = arith.constant dense<0.000000e+00> : vector<8xf32>
    %21 = vector.multi_reduction <add>, %20, %cst_10 [1] : vector<8x8xf32> to vector<8xf32>
    %22 = vector.shape_cast %21 : vector<8xf32> to vector<8x1xf32>
    %23 = vector.broadcast %22 : vector<8x1xf32> to vector<8x8xf32>
    %24 = arith.divf %20, %23 : vector<8x8xf32>
    %25 = vector.shape_cast %24 : vector<8x8xf32> to vector<8x1x8xf32>
    "tpu.trace_start"() <{level = 10 : i32, message = "bqs,bsd->bqd"}> : () -> ()
    %cst_11 = arith.constant dense<0.000000e+00> : vector<8x1x32xf32>
    %26 = tpu.matmul %25, %0, %cst_11 {dimension_numbers = #tpu.dot_dimension_numbers<[2], [1], [1], [2], [0, 0, 0, 1, 1, 2], [0], [0]>} : vector<8x1x8xf32>, vector<8x8x32xf32>, vector<8x1x32xf32> -> vector<8x1x32xf32>
    "tpu.trace_stop"() : () -> ()
    %27 = vector.shape_cast %26 : vector<8x1x32xf32> to vector<8x32xf32>
    %c0_12 = arith.constant 0 : index
    %c0_13 = arith.constant 0 : index
    %28 = vector.load %arg5[%c0_12, %c0_13] : memref<8x32xf32, #tpu.memory_space<vmem>>, vector<8x32xf32>
    tpu.vector_store %arg5[%c0_12, %c0_13], %27 {strides = array<i32>} : memref<8x32xf32, #tpu.memory_space<vmem>>, vector<8x32xf32>,
    return
  }
  func.func @transform_0(%arg0: i32) -> (i32, i32, i32) {
    %c0_i32 = arith.constant 0 : i32
    %c0_i32_0 = arith.constant 0 : i32
    %c0_i32_1 = arith.constant 0 : i32
    return %arg0, %c0_i32, %c0_i32_0 : i32, i32, i32
  }
  func.func @transform_1(%arg0: i32) -> (i32, i32) {
    %c0_i32 = arith.constant 0 : i32
    %c0_i32_0 = arith.constant 0 : i32
    return %arg0, %c0_i32 : i32, i32
  }
  func.func @transform_2(%arg0: i32) -> (i32, i32) {
    %c0_i32 = arith.constant 0 : i32
    %c0_i32_0 = arith.constant 0 : i32
    %c0_i32_1 = arith.constant 0 : i32
    return %c0_i32, %c0_i32_0 : i32, i32
  }
  func.func @transform_3(%arg0: i32) -> (i32, i32) {
    %c0_i32 = arith.constant 0 : i32
    %c0_i32_0 = arith.constant 0 : i32
    %c0_i32_1 = arith.constant 0 : i32
    return %c0_i32, %c0_i32_0 : i32, i32
  }
  func.func @transform_4(%arg0: i32) -> (i32, i32) {
    %c0_i32 = arith.constant 0 : i32
    %c0_i32_0 = arith.constant 0 : i32
    return %arg0, %c0_i32 : i32, i32
  }
}

</mosaic_0001>

<bundles_post_ra>
// kernel: tpu_custom_call.1
= control target key start
LH: loop header
LB: loop body
LE: loop exit
PB: predicated region body
PF: predicated region fallthrough
CT: control target
= control target key end

     0   :  { %9 = vsyncpa [#allocation3], 0  ;;  %s1847_s0 = inlined_call_operand.hbm [shape: f32[8,8,32], index: 0, kind: input, shape index: {}]   ;;  %s1848_s1 = inlined_call_operand.hbm [shape: f32[8,32], index: 1, kind: input, shape index: {}]   ;;  %s1849_s2 = inlined_call_operand.hbm [shape: bf16[32,32], index: 2, kind: input, shape index: {}]   ;;  %s1850_s3 = inlined_call_operand.hbm [shape: f32[1,32], index: 3, kind: input, shape index: {}]   ;;  %s1851_s4 = inlined_call_operand.hbm [shape: f32[8,32], index: 4, kind: output, shape index: {}]  }
   0x1   :  { %10 = vsyncpa [#allocation6], 0 }
   0x2   :  { %11 = vsyncpa [#allocation9], 0 }
   0x3   :  { %12 = vsyncpa [#allocation4], 0  ;;  %s1534_s15 = smov [#allocation5]   ;;  %s1535_s17 = smov [#allocation2]  }
   0x4   :  { %s31_s16 = sshll.u32 %s1534_s15, 4  ;;  %s18_s18 = sshll.u32 %s1535_s17, 4  ;;  %s32_s16 = int_to_ptr.vmem [resolvable:$true] %s31_s16  ;;  %s1572_s18 = int_to_ptr.vmem [resolvable:$true] %s18_s18 }
   0x5   :  { %s1416_s21 = scalar_lea.hbm %s1848_s1, 128 }
   0x6   :  { %p1417_p0 = scmp.ne.s32.totalorder %s1848_s1, %s1416_s21  ;;  %p1420_p1 = scmp.lt.u32.totalorder %s1416_s21, %s1848_s1 }
   0x8   :  { %p1422_p2 = pnand %p1420_p1, %p1417_p0 }
   0xa   :  { %1425 = shalt.err (!%p1422_p2)
}
   0xb   :  { %s1426_s26 = scalar_lea.vmem %s32_s16, 128  ;;  %p1431_p4 = scmp.lt.s32.totalorder %s32_s16, %s32_s16 }
   0xc   :  { %p1427_p3 = scmp.ne.s32.totalorder %s32_s16, %s1426_s26  ;;  %p1432_p5 = scmp.lt.s32.totalorder %s1426_s26, %s1426_s26 }
   0xe   :  { %p1433_p6 = por %p1432_p5, %p1431_p4 }
  0x10   :  { %p1434_p7 = pnand %p1433_p6, %p1427_p3 }
  0x12   :  { %1437 = shalt.err (!%p1434_p7)
}
  0x13   :  { %34 = dma.hbm_to_vmem [thread:$0]  %s1848_s1, 128, %s32_s16, [#allocation6]  }
  0x14   :  { %s1438_s5 = scalar_lea.hbm %s1847_s0, 1024 }
  0x15   :  { %p1439_p8 = scmp.ne.s32.totalorder %s1847_s0, %s1438_s5  ;;  %p1442_p9 = scmp.lt.u32.totalorder %s1438_s5, %s1847_s0 }
  0x17   :  { %p1444_p10 = pnand %p1442_p9, %p1439_p8 }
  0x19   :  { %1447 = shalt.err (!%p1444_p10)
}
  0x1a   :  { %s1448_s10 = scalar_lea.vmem %s1572_s18, 1024  ;;  %p1453_p12 = scmp.lt.s32.totalorder %s1572_s18, %s1572_s18 }
  0x1b   :  { %p1449_p11 = scmp.ne.s32.totalorder %s1572_s18, %s1448_s10  ;;  %p1454_p13 = scmp.lt.s32.totalorder %s1448_s10, %s1448_s10 }
  0x1d   :  { %p1455_p0 = por %p1454_p13, %p1453_p12 }
  0x1f   :  { %p1456_p1 = pnand %p1455_p0, %p1449_p11 }
  0x21   :  { %1459 = shalt.err (!%p1456_p1)
}
  0x22   :  { %s1536_s1 = smov 128   ;;  %s1537_s11 = smov 8  }
  0x23   :  { %24 = dma.hbm_to_vmem [thread:$0]  %s1847_s0, 1024, %s1572_s18, [#allocation3], %s1536_s1, %s1536_s1, %s1537_s11  }
  0x24   :  { %s1538_s14 = smov [#allocation7]   ;;  %s1460_s19 = scalar_lea.hbm %s1849_s2, 256 }
  0x25   :  { %s40_s15 = sshll.u32 %s1538_s14, 4  ;;  %p1461_p2 = scmp.ne.s32.totalorder %s1849_s2, %s1460_s19  ;;  %s41_s15 = int_to_ptr.vmem [resolvable:$true] %s40_s15 }
  0x26   :  { %p1464_p3 = scmp.lt.u32.totalorder %s1460_s19, %s1849_s2 }
  0x28   :  { %p1466_p4 = pnand %p1464_p3, %p1461_p2 }
  0x2a   :  { %1469 = shalt.err (!%p1466_p4)
}
  0x2b   :  { %s1470_s24 = scalar_lea.vmem %s41_s15, 256  ;;  %p1475_p6 = scmp.lt.s32.totalorder %s41_s15, %s41_s15 }
  0x2c   :  { %p1471_p5 = scmp.ne.s32.totalorder %s41_s15, %s1470_s24  ;;  %p1476_p7 = scmp.lt.s32.totalorder %s1470_s24, %s1470_s24 }
  0x2e   :  { %p1477_p8 = por %p1476_p7, %p1475_p6 }
  0x30   :  { %p1478_p9 = pnand %p1477_p8, %p1471_p5 }
  0x32   :  { %1481 = shalt.err (!%p1478_p9)
}
  0x33   :  { %s1539_s0 = smov 64   ;;  %s1540_s18 = smov 4  }
  0x34   :  { %46 = dma.hbm_to_vmem [thread:$0]  %s1849_s2, 256, %s41_s15, [#allocation6], %s1539_s0, %s1539_s0, %s1540_s18  }
  0x35   :  { %s1541_s27 = smov [#allocation8]   ;;  %s1482_s5 = scalar_lea.hbm %s1850_s3, 16 }
  0x36   :  { %s53_s28 = sshll.u32 %s1541_s27, 4  ;;  %p1483_p10 = scmp.ne.s32.totalorder %s1850_s3, %s1482_s5  ;;  %s54_s28 = int_to_ptr.vmem [resolvable:$true] %s53_s28 }
  0x37   :  { %p1486_p11 = scmp.lt.u32.totalorder %s1482_s5, %s1850_s3 }
  0x39   :  { %p1488_p12 = pnand %p1486_p11, %p1483_p10 }
  0x3b   :  { %1491 = shalt.err (!%p1488_p12)
}
  0x3c   :  { %s1492_s10 = scalar_lea.vmem %s54_s28, 16  ;;  %s1496_s2 = scalar_lea.vmem %s54_s28, 32 }
  0x3d   :  { %p1493_p13 = scmp.ne.s32.totalorder %s54_s28, %s1492_s10  ;;  %p1497_p0 = scmp.lt.s32.totalorder %s54_s28, %s54_s28 }
  0x3e   :  { %p1498_p1 = scmp.lt.s32.totalorder %s1496_s2, %s1492_s10 }
  0x40   :  { %p1499_p2 = por %p1498_p1, %p1497_p0 }
  0x42   :  { %p1500_p3 = pnand %p1499_p2, %p1493_p13 }
  0x44   :  { %1503 = shalt.err (!%p1500_p3)
}
  0x45   :  { %56 = dma.hbm_to_vmem [thread:$0]  %s1850_s3, 16, %s54_s28, [#allocation9]  }
  0x46   :  { %1526 = dma.done.wait [#allocation3], 1024  }
  0x47   :  { %1527 = vsyncadd [#allocation3], 4294966272 }
  0x48   :  { %1528 = dma.done.wait [#allocation6], 384  }
  0x49   :  { %1529 = vsyncadd [#allocation6], 4294966912 }
  0x4a   :  { %1530 = dma.done.wait [#allocation9], 16  }
  0x4b   :  { %1531 = vsyncadd [#allocation9], 4294967280  ;;  %v1365_v0 = vld [vmem:[#allocation7] sm:$0xff]   ;;  %v1366_v1 = vld [vmem:[#allocation7 + $0x8] sm:$0xff]   ;;  %vm98_vm0 = vcmask 261120   ;;  %v182_v16 = vlaneseq  ;;  %vm364_vm1 = vcmask 1041409  }
  0x4c   :  { %1298 = vmatprep.subr.bf16.mxu0 %v1365_v0  ;;  %v1627_v2 = vld [vmem:[#allocation2] sm:$0xff]  ;;  %v1629_v3 = vld [vmem:[#allocation2 + $0x8] sm:$0xff]  ;;  %v1633_v5 = vld [vmem:[#allocation2 + $0x10] sm:$0xff]  ;;  %v1542_v14 = vmov 1966171168   ;;  %vm366_vm2 = vcmask 1042434  }
  0x4d   :  { %1299 = vmatpush3.bf16.msra.mxu0 %v1365_v0  ;;  %v78_v4 = vpack.c.bf16 %v1629_v3, %v1627_v2  ;;  %v1635_v6 = vld [vmem:[#allocation2 + $0x18] sm:$0xff]  ;;  %v1637_v7 = vld [vmem:[#allocation2 + $0x20] sm:$0xff]  ;;  %v1639_v8 = vld [vmem:[#allocation2 + $0x28] sm:$0xff]  ;;  %v180_v15 = vunpack.c.l.s4 %v1542_v14  ;;  %v1656_v18 = vshrl.u32 %v182_v16, 7  ;;  %vm368_vm3 = vcmask 1043459   ;;  %s1546_s3 = smov [#allocation10]  }
  0x4e   :  { %1300 = vmatprep.subr.bf16.mxu0 %v1366_v1  ;;  %v79_v9 = vpack.c.bf16 %v1635_v6, %v1633_v5  ;;  %v80_v10 = vpack.c.bf16 %v1639_v8, %v1637_v7  ;;  %v1648_v11 = vld [vmem:[#allocation2 + $0x30] sm:$0xff]  ;;  %v1650_v12 = vld [vmem:[#allocation2 + $0x38] sm:$0xff]  ;;  %v176_v20 = vld [vmem:[#allocation5] sm:$0xff]  ;;  %vm370_vm4 = vcmask 1044484   ;;  %vm372_vm5 = vcmask 1045509   ;;  %s1250_s12 = sshll.u32 %s1546_s3, 4  ;;  %s1251_s12 = int_to_ptr.vmem [resolvable:$true] %s1250_s12 }
  0x4f   :  { %1302 = vmatprep.mubr.msk.bf16.mxu0 %vm98_vm0, %v78_v4  ;;  %v81_v13 = vpack.c.bf16 %v1650_v12, %v1648_v11  ;;  %v181_v17 = vunpack.c.0.s8 %v180_v15  ;;  %v178_v23 = vcombine.high %v176_v20, %v176_v20  ;;  %v1660_v28 = vsub.s32 0, %v1656_v18  ;;  %v1267_v58 = vld [vmem:[#allocation8] ss:$0 sm:$0xff]  ;;  %s1504_s13 = scalar_lea.vmem %s1251_s12, 128  ;;  %p1509_p5 = scmp.lt.s32.totalorder %s1251_s12, %s1251_s12 }
  0x50   :  { %vm374_vm6 = vcmask 1046534   ;;  %vm376_vm7 = vcmask 1047559   ;;  %vm379_vm8 = vcmask 64512   ;;  %vm1545_vm9 = vmmov 0   ;;  %p1505_p4 = scmp.ne.s32.totalorder %s1251_s12, %s1504_s13  ;;  %p1510_p6 = scmp.lt.s32.totalorder %s1504_s13, %s1504_s13 }
  0x51   :  { %1301 = vmatpush3.bf16.msra.mxu0 %v1366_v1  ;;  %v184_v19 = vsub.s32 %v181_v17, %v1656_v18 }
  0x52   :  { %p1511_p7 = por %p1510_p6, %p1509_p5 }
  0x53   :  { %v185_v21 = vrot.slane %v176_v20, %v184_v19  ;;  %v192_v26 = vrot.slane %v178_v23, %v184_v19 }
  0x54   :  { %1303 = vmatmul.mubr.msk.bf16.vlgmr.msra.gmra.mrb[0].mxu0 %vm98_vm0, %v79_v9  ;;  %p1512_p8 = pnand %p1511_p7, %p1505_p4 }
  0x55   :  { %1306 = vmatprep.mubr.msk.bf16.mxu0 %vm98_vm0, %v80_v10  ;;  %v193_v22 = vcombine.high %v185_v21, %v185_v21  ;;  %v201_v24 = vrot.slane %v185_v21, %v184_v19  ;;  %v194_v30 = vcombine.high %v192_v26, %v192_v26  ;;  %v208_v32 = vrot.slane %v192_v26, %v184_v19 }
  0x57   :  { %v215_v25 = vrot.slane %v193_v22, %v184_v19  ;;  %v223_v27 = vcombine.high %v201_v24, %v201_v24  ;;  %v230_v33 = vrot.slane %v201_v24, %v1660_v28  ;;  %v222_v35 = vrot.slane %v194_v30, %v184_v19 }
  0x58   :  { %v224_v40 = vcombine.high %v208_v32, %v208_v32  ;;  %v246_v48 = vrot.slane %v208_v32, %v1660_v28 }
  0x59   :  { %v225_v29 = vcombine.high %v215_v25, %v215_v25  ;;  %v238_v31 = vrot.slane %v223_v27, %v1660_v28  ;;  %v234_v37 = vrot.slane %v215_v25, %v1660_v28  ;;  %v226_v45 = vcombine.high %v222_v35, %v222_v35 }
  0x5a   :  { %v254_v47 = vrot.slane %v224_v40, %v1660_v28  ;;  %v250_v51 = vrot.slane %v222_v35, %v1660_v28 }
  0x5b   :  { %v242_v34 = vrot.slane %v225_v29, %v1660_v28  ;;  %v258_v49 = vrot.slane %v226_v45, %v1660_v28 }
  0x5c   :  { %1307 = vmatmul.mubr.msk.bf16.gmra.mrb[4].mxu0 %vm98_vm0, %v81_v13 }
 0x127   :  { %v1304_v36 = vpop.f32.mrb[0].mxu0 }
 0x128   :  { %v269_v38 = vadd.f32 %v1304_v36, %v238_v31  ;;  %v145_v39 = vpop.f32.mrb[1].mxu0  ;;  %v331_v31 = vand.u32 127, %v182_v16 }
 0x129   :  { %v267_v41 = vadd.f32 %v230_v33, %v145_v39  ;;  %v1305_v42 = vpop.f32.mrb[2].mxu0 }
 0x12a   :  { %1368 = vtanh.f32 %v269_v38  ;;  %v270_v43 = vadd.f32 %v1305_v42, %v242_v34  ;;  %v148_v44 = vpop.f32.mrb[3].mxu0  ;;  %v1680_v34 = vsub.s32 %v331_v31, %v1656_v18 }
 0x12b   :  { %1370 = vtanh.f32 %v267_v41  ;;  %v268_v46 = vadd.f32 %v234_v37, %v148_v44 }
 0x12c   :  { %1372 = vtanh.f32 %v270_v43 }
 0x12d   :  { %1374 = vtanh.f32 %v268_v46 }
 0x12f   :  { %v1308_v50 = vpop.f32.mrb[4].mxu0 }
 0x130   :  { %v273_v52 = vadd.f32 %v1308_v50, %v254_v47  ;;  %v161_v53 = vpop.f32.mrb[5].mxu0 }
 0x131   :  { %v271_v54 = vadd.f32 %v246_v48, %v161_v53  ;;  %v1309_v55 = vpop.f32.mrb[6].mxu0 }
 0x132   :  { %1376 = vtanh.f32 %v273_v52  ;;  %v274_v56 = vadd.f32 %v1309_v55, %v258_v49  ;;  %v164_v57 = vpop.f32.mrb[7].mxu0 }
 0x133   :  { %1378 = vtanh.f32 %v271_v54  ;;  %v272_v59 = vadd.f32 %v250_v51, %v164_v57  ;;  %v390_v57 = vsub.s32 1, %v1656_v18 }
 0x134   :  { %v1369_v60 = vpop.eup %1368  ;;  %1380 = vtanh.f32 %v274_v56  ;;  %v1543_v56 = vmov 0  }
 0x135   :  { %v1371_v61 = vpop.eup %1370  ;;  %1382 = vtanh.f32 %v272_v59  ;;  %v292_v62 = vmul.f32 %v1369_v60, %v1267_v58  ;;  %1364 = vset.pattern.permute.xlu0 %v1543_v56  ;;  %1363 = vset.pattern.permute.xlu1 %v1543_v56  ;;  %v398_v59 = vsub.s32 3, %v1656_v18 }
 0x136   :  { %v1373_v63 = vpop.eup %1372  ;;  %v290_v0 = vmul.f32 %v1371_v61, %v1267_v58 }
 0x137   :  { %v1375_v1 = vpop.eup %1374  ;;  %v304_v4 = vsel %vm98_vm0, %v292_v62, 0.0  ;;  %v293_v9 = vmul.f32 %v1373_v63, %v1267_v58 }
 0x138   :  { %305 = vadd.xlane.f32.xlu1 %v304_v4  ;;  %v298_v10 = vsel %vm98_vm0, %v290_v0, 0.0  ;;  %v291_v13 = vmul.f32 %v1375_v1, %v1267_v58  ;;  %v402_v0 = vsub.s32 4, %v1656_v18 }
 0x139   :  { %299 = vadd.xlane.f32.xlu0 %v298_v10  ;;  %v307_v14 = vsel %vm98_vm0, %v293_v9, 0.0 }
 0x13a   :  { %v301_v17 = vsel %vm98_vm0, %v291_v13, 0.0 }
 0x13c   :  { %v1377_v15 = vpop.eup %1376  ;;  %308 = vadd.xlane.f32.xlu1 %v307_v14 }
 0x13d   :  { %v1379_v19 = vpop.eup %1378  ;;  %302 = vadd.xlane.f32.xlu0 %v301_v17  ;;  %v296_v25 = vmul.f32 %v1377_v15, %v1267_v58  ;;  %v406_v15 = vsub.s32 5, %v1656_v18 }
 0x13e   :  { %v1381_v20 = vpop.eup %1380  ;;  %v294_v21 = vmul.f32 %v1379_v19, %v1267_v58 }
 0x13f   :  { %v1383_v22 = vpop.eup %1382  ;;  %v297_v27 = vmul.f32 %v1381_v20, %v1267_v58  ;;  %v316_v29 = vsel %vm98_vm0, %v296_v25, 0.0  ;;  %v414_v25 = vsub.s32 7, %v1656_v18 }
 0x140   :  { %v310_v23 = vsel %vm98_vm0, %v294_v21, 0.0  ;;  %v295_v24 = vmul.f32 %v1383_v22, %v1267_v58  ;;  %v394_v58 = vsub.s32 2, %v1656_v18  ;;  %v410_v21 = vsub.s32 6, %v1656_v18 }
 0x141   :  { %311 = vadd.xlane.f32.xlu0 %v310_v23  ;;  %v319_v30 = vsel %vm98_vm0, %v297_v27, 0.0 }
 0x142   :  { %v313_v26 = vsel %vm98_vm0, %v295_v24, 0.0 }
 0x143   :  { %314 = vadd.xlane.f32.xlu1 %v313_v26 }
 0x145   :  { %317 = vadd.xlane.f32.xlu0 %v316_v29 }
 0x147   :  { %320 = vadd.xlane.f32.xlu1 %v319_v30 }
 0x1c5   :  { %v306_v32 = vpop.xlane.xlu1 %305 }
 0x1c6   :  { %v300_v33 = vpop.xlane.xlu0 %299  ;;  %v343_v39 = vrot.slane %v306_v32, %v1680_v34 }
 0x1c7   :  { %v335_v37 = vrot.slane %v300_v33, %v1680_v34 }
 0x1c9   :  { %v309_v35 = vpop.xlane.xlu1 %308 }
 0x1ca   :  { %v303_v36 = vpop.xlane.xlu0 %302  ;;  %v347_v40 = vrot.slane %v309_v35, %v1680_v34 }
 0x1cb   :  { %v339_v38 = vrot.slane %v303_v36, %v1680_v34 }
 0x1cd   :  { %v365_v16 = vsel %vm364_vm1, %v339_v38, %v335_v37 }
 0x1ce   :  { %v367_v41 = vsel %vm366_vm2, %v343_v39, %v365_v16  ;;  %v312_v42 = vpop.xlane.xlu0 %311 }
 0x1cf   :  { %v369_v43 = vsel %vm368_vm3, %v347_v40, %v367_v41  ;;  %v351_v44 = vrot.slane %v312_v42, %v1680_v34 }
 0x1d0   :  { %v315_v45 = vpop.xlane.xlu1 %314 }
 0x1d1   :  { %v371_v46 = vsel %vm370_vm4, %v351_v44, %v369_v43  ;;  %v355_v47 = vrot.slane %v315_v45, %v1680_v34 }
 0x1d2   :  { %v318_v48 = vpop.xlane.xlu0 %317 }
 0x1d3   :  { %v359_v49 = vrot.slane %v318_v48, %v1680_v34  ;;  %v373_v50 = vsel %vm372_vm5, %v355_v47, %v371_v46 }
 0x1d4   :  { %v321_v51 = vpop.xlane.xlu1 %320 }
 0x1d5   :  { %v363_v52 = vrot.slane %v321_v51, %v1680_v34  ;;  %v375_v53 = vsel %vm374_vm6, %v359_v49, %v373_v50 }
 0x1d7   :  { %v377_v54 = vsel %vm376_vm7, %v363_v52, %v375_v53 }
 0x1d8   :  { %v380_v55 = vsel %vm379_vm8, %v377_v54, -inf }
 0x1d9   :  { %381 = vmax.xlane.f32.xlu0 %v380_v55 }
 0x266   :  { %v382_v60 = vpop.xlane.xlu0 %381 }
 0x267   :  { %v387_v61 = vrot.slane %v382_v60, %v1660_v28  ;;  %v391_v62 = vrot.slane %v382_v60, %v390_v57  ;;  %v395_v63 = vrot.slane %v382_v60, %v394_v58  ;;  %v399_v1 = vrot.slane %v382_v60, %v398_v59 }
 0x268   :  { %v403_v17 = vrot.slane %v382_v60, %v402_v0  ;;  %v407_v22 = vrot.slane %v382_v60, %v406_v15  ;;  %v411_v26 = vrot.slane %v382_v60, %v410_v21 }
 0x269   :  { %v424_v4 = vsub.f32 %v300_v33, %v387_v61  ;;  %v425_v9 = vsub.f32 %v303_v36, %v391_v62  ;;  %v426_v10 = vsub.f32 %v306_v32, %v395_v63  ;;  %v427_v19 = vsub.f32 %v309_v35, %v399_v1 }
 0x26a   :  { %v428_v23 = vsub.f32 %v312_v42, %v403_v17  ;;  %v429_v27 = vsub.f32 %v315_v45, %v407_v22  ;;  %v415_v32 = vrot.slane %v382_v60, %v414_v25  ;;  %v430_v33 = vsub.f32 %v318_v48, %v411_v26 }
 0x26b   :  { %v432_v13 = vmul.f32 1.442695, %v424_v4  ;;  %v434_v14 = vmul.f32 1.442695, %v425_v9  ;;  %v436_v20 = vmul.f32 1.442695, %v426_v10 }
 0x26c   :  { %v438_v24 = vmul.f32 1.442695, %v427_v19  ;;  %v440_v29 = vmul.f32 1.442695, %v428_v23  ;;  %v442_v35 = vmul.f32 1.442695, %v429_v27  ;;  %v431_v37 = vsub.f32 %v321_v51, %v415_v32 }
 0x26d   :  { %1384 = vpow2.f32 %v432_v13  ;;  %v444_v38 = vmul.f32 1.442695, %v430_v33 }
 0x26e   :  { %1386 = vpow2.f32 %v434_v14  ;;  %v446_v40 = vmul.f32 1.442695, %v431_v37 }
 0x26f   :  { %1388 = vpow2.f32 %v436_v20 }
 0x270   :  { %1390 = vpow2.f32 %v438_v24 }
 0x271   :  { %1392 = vpow2.f32 %v440_v29 }
 0x272   :  { %1394 = vpow2.f32 %v442_v35 }
 0x273   :  { %1396 = vpow2.f32 %v444_v38 }
 0x274   :  { %1398 = vpow2.f32 %v446_v40 }
 0x277   :  { %v1385_v30 = vpop.eup %1384 }
 0x278   :  { %v1718_v31 = vpop.eup %1386  ;;  %457 = vperm.xlu1 %1363, %v1385_v30  }
 0x279   :  { %460 = vperm.xlu0 %1364, %v1718_v31   ;;  %v1723_v36 = vpop.eup %1388 }
 0x27a   :  { %v1726_v39 = vpop.eup %1390 }
 0x27b   :  { %v1729_v16 = vpop.eup %1392 }
 0x27c   :  { %463 = vperm.xlu1 %1363, %v1723_v36   ;;  %v1732_v41 = vpop.eup %1394 }
 0x27d   :  { %v1735_v42 = vpop.eup %1396 }
 0x27e   :  { %v1738_v43 = vpop.eup %1398 }
 0x280   :  { %466 = vperm.xlu1 %1363, %v1726_v39  }
 0x284   :  { %469 = vperm.xlu1 %1363, %v1729_v16  }
 0x288   :  { %472 = vperm.xlu1 %1363, %v1732_v41  }
 0x28c   :  { %475 = vperm.xlu1 %1363, %v1735_v42  }
 0x290   :  { %478 = vperm.xlu1 %1363, %v1738_v43  }
 0x2f7   :  { %v458_v44 = vpop.permute.xlu1 %457 }
 0x2f8   :  { %v461_v48 = vpop.permute.xlu0 %460  ;;  %v483_v51 = vrot.slane %v458_v44, %v1680_v34 }
 0x2f9   :  { %v487_v50 = vrot.slane %v461_v48, %v1680_v34 }
 0x2fb   :  { %v464_v45 = vpop.permute.xlu1 %463  ;;  %v512_v56 = vsel %vm364_vm1, %v487_v50, %v483_v51 }
 0x2fc   :  { %v491_v52 = vrot.slane %v464_v45, %v1680_v34 }
 0x2fe   :  { %v513_v61 = vsel %vm366_vm2, %v491_v52, %v512_v56 }
 0x2ff   :  { %v467_v46 = vpop.permute.xlu1 %466 }
 0x300   :  { %v495_v53 = vrot.slane %v467_v46, %v1680_v34 }
 0x302   :  { %v514_v63 = vsel %vm368_vm3, %v495_v53, %v513_v61 }
 0x303   :  { %v470_v47 = vpop.permute.xlu1 %469 }
 0x304   :  { %v499_v54 = vrot.slane %v470_v47, %v1680_v34 }
 0x306   :  { %v515_v1 = vsel %vm370_vm4, %v499_v54, %v514_v63 }
 0x307   :  { %v473_v49 = vpop.permute.xlu1 %472 }
 0x308   :  { %v503_v60 = vrot.slane %v473_v49, %v1680_v34 }
 0x30a   :  { %v516_v9 = vsel %vm372_vm5, %v503_v60, %v515_v1 }
 0x30b   :  { %v476_v55 = vpop.permute.xlu1 %475 }
 0x30c   :  { %v507_v62 = vrot.slane %v476_v55, %v1680_v34 }
 0x30e   :  { %v517_v13 = vsel %vm374_vm6, %v507_v62, %v516_v9 }
 0x30f   :  { %v479_v4 = vpop.permute.xlu1 %478 }
 0x310   :  { %v511_v10 = vrot.slane %v479_v4, %v1680_v34 }
 0x312   :  { %v518_v14 = vsel %vm376_vm7, %v511_v10, %v517_v13 }
 0x313   :  { %v520_v17 = vsel %vm379_vm8, %v518_v14, 0.0 }
 0x314   :  { %521 = vadd.xlane.f32.xlu1 %v520_v17 }
 0x3a1   :  { %v522_v19 = vpop.xlane.xlu1 %521 }
 0x3a2   :  { %v527_v20 = vrot.slane %v522_v19, %v1660_v28  ;;  %v531_v22 = vrot.slane %v522_v19, %v390_v57  ;;  %v535_v23 = vrot.slane %v522_v19, %v394_v58  ;;  %v539_v24 = vrot.slane %v522_v19, %v398_v59 }
 0x3a3   :  { %v543_v27 = vrot.slane %v522_v19, %v402_v0  ;;  %v547_v28 = vrot.slane %v522_v19, %v406_v15  ;;  %v1544_v57 = vmov 0.0   ;;  %v551_v0 = vrot.slane %v522_v19, %v410_v21 }
 0x3a4   :  { %1400 = vrcp.f32 %v527_v20  ;;  %1310 = vmatprep.subr.mxu1 %v1544_v57  ;;  %1312 = vmatprep.mubr.msk.f32.mxu1 %vm1545_vm9, %v1544_v57 }
 0x3a5   :  { %1402 = vrcp.f32 %v531_v22  ;;  %1311 = vmatpush3.msra.mxu1 %v1627_v2  ;;  %1340 = vmatprep.subr.mxu0 %v1544_v57  ;;  %v555_v2 = vrot.slane %v522_v19, %v414_v25 }
 0x3a6   :  { %1404 = vrcp.f32 %v535_v23  ;;  %1315 = vmatprep.subr.mxu1 %v1544_v57  ;;  %1341 = vmatpush3.msra.mxu0 %v1648_v11 }
 0x3a7   :  { %1406 = vrcp.f32 %v539_v24  ;;  %1342 = vmatprep.mubr.msk.f32.mxu0 %vm1545_vm9, %v1544_v57 }
 0x3a8   :  { %1408 = vrcp.f32 %v543_v27 }
 0x3a9   :  { %1410 = vrcp.f32 %v547_v28 }
 0x3aa   :  { %1412 = vrcp.f32 %v551_v0 }
 0x3ab   :  { %1414 = vrcp.f32 %v555_v2 }
 0x3ae   :  { %v1401_v26 = vpop.eup %1400 }
 0x3af   :  { %v565_v29 = vmul.f32 %v1401_v26, %v1385_v30  ;;  %v1403_v32 = vpop.eup %1402 }
 0x3b0   :  { %v567_v58 = vmul.f32 %v1403_v32, %v1718_v31  ;;  %v1405_v59 = vpop.eup %1404 }
 0x3b1   :  { %582 = vperm.xlu0 %1364, %v565_v29   ;;  %v569_v15 = vmul.f32 %v1405_v59, %v1723_v36  ;;  %v1407_v30 = vpop.eup %1406 }
 0x3b2   :  { %v571_v31 = vmul.f32 %v1407_v30, %v1726_v39  ;;  %v1409_v33 = vpop.eup %1408 }
 0x3b3   :  { %v573_v11 = vmul.f32 %v1409_v33, %v1729_v16  ;;  %v1411_v35 = vpop.eup %1410 }
 0x3b4   :  { %v575_v37 = vmul.f32 %v1411_v35, %v1732_v41  ;;  %v1413_v21 = vpop.eup %1412 }
 0x3b5   :  { %662 = vperm.xlu0 %1364, %v567_v58   ;;  %v577_v36 = vmul.f32 %v1413_v21, %v1735_v42  ;;  %v1415_v38 = vpop.eup %1414 }
 0x3b6   :  { %v579_v18 = vmul.f32 %v1415_v38, %v1738_v43 }
 0x3b9   :  { %742 = vperm.xlu0 %1364, %v569_v15  }
 0x3bd   :  { %822 = vperm.xlu0 %1364, %v571_v31  }
 0x3c1   :  { %902 = vperm.xlu0 %1364, %v573_v11  }
 0x3c5   :  { %982 = vperm.xlu0 %1364, %v575_v37  }
 0x3c9   :  { %1062 = vperm.xlu0 %1364, %v577_v36  }
 0x3cd   :  { %1142 = vperm.xlu0 %1364, %v579_v18  }
 0x430   :  { %v583_v25 = vpop.permute.xlu0 %582 }
 0x431   :  { %v587_v39 = vrot.slane %v583_v25, %v1680_v34 }
 0x433   :  { %1313 = vmatmul.mubr.msk.f32.vlgmr.msra.gmra.mrb[0].mxu1 %vm379_vm8, %v587_v39 }
 0x434   :  { %v663_v40 = vpop.permute.xlu0 %662  ;;  %1316 = vmatpush3.msra.mxu1 %v1629_v3  ;;  %1317 = vmatprep.mubr.msk.f32.mxu1 %vm1545_vm9, %v1544_v57 }
 0x435   :  { %v667_v16 = vrot.slane %v663_v40, %v1680_v34  ;;  %1320 = vmatprep.subr.mxu1 %v1544_v57 }
 0x437   :  { %1318 = vmatmul.mubr.msk.f32.vlgmr.msra.gmra.mrb[2].mxu1 %vm379_vm8, %v667_v16 }
 0x438   :  { %v743_v41 = vpop.permute.xlu0 %742  ;;  %1321 = vmatpush3.msra.mxu1 %v1633_v5  ;;  %1322 = vmatprep.mubr.msk.f32.mxu1 %vm1545_vm9, %v1544_v57 }
 0x439   :  { %v747_v42 = vrot.slane %v743_v41, %v1680_v34  ;;  %1325 = vmatprep.subr.mxu1 %v1544_v57 }
 0x43b   :  { %1323 = vmatmul.mubr.msk.f32.vlgmr.msra.gmra.mrb[4].mxu1 %vm379_vm8, %v747_v42 }
 0x43c   :  { %v823_v3 = vpop.permute.xlu0 %822  ;;  %1326 = vmatpush3.msra.mxu1 %v1635_v6  ;;  %1327 = vmatprep.mubr.msk.f32.mxu1 %vm1545_vm9, %v1544_v57 }
 0x43d   :  { %v827_v43 = vrot.slane %v823_v3, %v1680_v34  ;;  %1330 = vmatprep.subr.mxu1 %v1544_v57 }
 0x43f   :  { %1328 = vmatmul.mubr.msk.f32.vlgmr.msra.gmra.mrb[6].mxu1 %vm379_vm8, %v827_v43 }
 0x440   :  { %v903_v5 = vpop.permute.xlu0 %902  ;;  %1331 = vmatpush3.msra.mxu1 %v1637_v7  ;;  %1332 = vmatprep.mubr.msk.f32.mxu1 %vm1545_vm9, %v1544_v57 }
 0x441   :  { %v907_v44 = vrot.slane %v903_v5, %v1680_v34  ;;  %1335 = vmatprep.subr.mxu1 %v1544_v57 }
 0x443   :  { %1333 = vmatmul.mubr.msk.f32.vlgmr.msra.gmra.mrb[8].mxu1 %vm379_vm8, %v907_v44 }
 0x444   :  { %v983_v6 = vpop.permute.xlu0 %982  ;;  %1336 = vmatpush3.msra.mxu1 %v1639_v8  ;;  %1337 = vmatprep.mubr.msk.f32.mxu1 %vm1545_vm9, %v1544_v57 }
 0x445   :  { %v987_v45 = vrot.slane %v983_v6, %v1680_v34  ;;  %1345 = vmatprep.subr.mxu1 %v1544_v57 }
 0x447   :  { %1338 = vmatmul.mubr.msk.f32.vlgmr.msra.gmra.mrb[10].mxu1 %vm379_vm8, %v987_v45 }
 0x448   :  { %v1063_v7 = vpop.permute.xlu0 %1062  ;;  %1346 = vmatpush3.msra.mxu1 %v1650_v12  ;;  %1347 = vmatprep.mubr.msk.f32.mxu1 %vm1545_vm9, %v1544_v57 }
 0x449   :  { %v1067_v46 = vrot.slane %v1063_v7, %v1680_v34 }
 0x44b   :  { %1343 = vmatmul.mubr.msk.f32.vlgmr.msra.gmra.mrb[8].mxu0 %vm379_vm8, %v1067_v46 }
 0x44c   :  { %v1143_v8 = vpop.permute.xlu0 %1142 }
 0x44d   :  { %v1147_v47 = vrot.slane %v1143_v8, %v1680_v34 }
 0x44f   :  { %1348 = vmatmul.mubr.msk.f32.vlgmr.msra.gmra.mrb[12].mxu1 %vm379_vm8, %v1147_v47 }
 0x506   :  { %v656_v48 = vpop.f32.mrb[0].mxu1 }
 0x507   :  { %v1314_v49 = vpop.f32.mrb[1].mxu1 }
 0x50a   :  { %v736_v50 = vpop.f32.mrb[2].mxu1 }
 0x50b   :  { %v1228_v51 = vrot.slane %v736_v50, 7  ;;  %v1319_v52 = vpop.f32.mrb[3].mxu1 }
 0x50d   :  { %v1229_v53 = vsel %vm364_vm1, %v1228_v51, %v656_v48 }
 0x50e   :  { %v816_v12 = vpop.f32.mrb[4].mxu1 }
 0x50f   :  { %v1230_v54 = vrot.slane %v816_v12, 6  ;;  %v1324_v55 = vpop.f32.mrb[5].mxu1 }
 0x511   :  { %v1231_v56 = vsel %vm366_vm2, %v1230_v54, %v1229_v53 }
 0x512   :  { %v896_v60 = vpop.f32.mrb[6].mxu1 }
 0x513   :  { %v1232_v61 = vrot.slane %v896_v60, 5  ;;  %v1329_v62 = vpop.f32.mrb[7].mxu1 }
 0x515   :  { %v1233_v63 = vsel %vm368_vm3, %v1232_v61, %v1231_v56 }
 0x516   :  { %v976_v34 = vpop.f32.mrb[8].mxu1 }
 0x517   :  { %v1234_v1 = vrot.slane %v976_v34, 4  ;;  %v1334_v4 = vpop.f32.mrb[9].mxu1 }
 0x519   :  { %v1235_v9 = vsel %vm370_vm4, %v1234_v1, %v1233_v63 }
 0x51a   :  { %v1056_v10 = vpop.f32.mrb[10].mxu1 }
 0x51b   :  { %v1236_v13 = vrot.slane %v1056_v10, 3  ;;  %v1339_v14 = vpop.f32.mrb[11].mxu1 }
 0x51d   :  { %v1237_v17 = vsel %vm372_vm5, %v1236_v13, %v1235_v9 }
 0x51e   :  { %v1136_v19 = vpop.f32.mrb[8].mxu0 }
 0x51f   :  { %v1238_v20 = vrot.slane %v1136_v19, 2  ;;  %v1344_v22 = vpop.f32.mrb[9].mxu0 }
 0x521   :  { %v1239_v23 = vsel %vm374_vm6, %v1238_v20, %v1237_v17 }
 0x522   :  { %v1216_v24 = vpop.f32.mrb[12].mxu1 }
 0x523   :  { %v1240_v26 = vrot.slane %v1216_v24, 1  ;;  %v1349_v27 = vpop.f32.mrb[13].mxu1 }
 0x525   :  { %v1241_v29 = vsel %vm376_vm7, %v1240_v26, %v1239_v23 }
 0x526   :  { %1243 = vst.msk [vmem:[#allocation10] sm:$0xff] %vm98_vm0, %v1241_v29 }
 0x527   :  { %1515 = shalt.err (!%p1512_p8)
}
 0x528   :  { %s1516_s16 = scalar_lea.hbm %s1851_s4, 128 }
 0x529   :  { %p1517_p9 = scmp.ne.s32.totalorder %s1851_s4, %s1516_s16  ;;  %p1520_p10 = scmp.lt.u32.totalorder %s1516_s16, %s1851_s4 }
 0x52b   :  { %p1522_p11 = pnand %p1520_p10, %p1517_p9 }
 0x52d   :  { %1525 = shalt.err (!%p1522_p11)
}
 0x52e   :  { %1253 = dma.vmem_to_hbm [thread:$0]  %s1251_s12, 128, %s1851_s4, [#allocation4]  }
 0x52f   :  { %1532 = dma.done.wait [#allocation4], 128  }
 0x530   :  { %1533 = vsyncadd [#allocation4], 4294967168 }
 0x531   :  { %1257 = vsyncpa [#allocation3], 1 }
 0x532   :  { %1258 = vsyncpa [#allocation6], 1 }
 0x533   :  { %1259 = vsyncpa [#allocation9], 1 }
 0x534   :  { %1260 = vsyncpa [#allocation4], 1 }

</bundles_post_ra>
